<compile_context>
chip_gen: v6e
topology: v6e:2x2x1
jax: 0.10.0
libtpu: 0.0.40
codegen_flags: <defaults>
</compile_context>

<pallas_src>
import functools

import jax
import jax.numpy as jnp
from jax.experimental import pallas as pl
from jax.experimental.pallas import tpu as pltpu


# Per-step VMEM budget for the in-kernel intermediates (one-hot + iota [V, tn]
# f32, double-buffered [D, tn] output, double-buffered [1, tn] index tile).
_VMEM_INTERMEDIATE_BUDGET = 24 * 1024 * 1024
# Explicit scoped-VMEM limit: above the 32 MiB default, below v7x's 64 MiB/TC.
_VMEM_LIMIT_BYTES = 48 * 1024 * 1024


def _round_up(x: int, m: int) -> int:
    return ((x + m - 1) // m) * m


def _choose_tn(n: int, v: int, d: int, tn_max: int) -> int:
    """Pick a lane-aligned index-tile size.

    Large enough to amortize the ~0.35 us/step grid overhead, small enough that
    the [V, tn] one-hot/iota intermediates + double-buffered I/O fit the VMEM
    budget, and (for large N) small enough that the grid has >= 4 steps so the
    "parallel" axis can actually be sharded across v7x's two TensorCores.
    """
    per_col_bytes = (2 * v + 2 * d + 2) * 4          # onehot+iota, 2x out, 2x idx
    tn_fit = max(128, (_VMEM_INTERMEDIATE_BUDGET // per_col_bytes) // 128 * 128)
    tn = min(tn_max, tn_fit)
    # Don't pad tiny inputs past one lane-aligned tile.
    tn = min(tn, _round_up(n, 128))
    # Keep >= ~4 grid steps for large N (megacore sharding + DMA/compute overlap),
    # but never shrink tiles below 512.
    if n >= 4 * 512:
        tn = min(tn, max(512, _round_up((n + 3) // 4, 128)))
    return max(128, tn)


def _embed_gather_kernel(idx_ref, table_t_ref, out_ref):
    """Gather table rows for one tile of indices via a one-hot matmul (MXU).

    idx_ref:     [1, tn]  int32      lane-major index tile
    table_t_ref: [D, V]   table dt   transposed table, whole, VMEM-resident
    out_ref:     [D, tn]  table dt   lane-dense output tile
    """
    idx = idx_ref[...]                                          # [1, tn]
    v = table_t_ref.shape[1]
    tn = idx.shape[1]
    iota_v = jax.lax.broadcasted_iota(jnp.int32, (v, tn), 0)    # [V, tn]
    onehot = (iota_v == idx).astype(table_t_ref.dtype)          # [V, tn]
    # out[d, i] = sum_v table_t[d, v] * onehot[v, i] = table[idx[i], d]
    # f32 accumulation on the MXU; exactness vs. a plain gather is asserted in
    # __main__ (would catch a bf16 demotion of the f32 matmul).
    out = jnp.dot(table_t_ref[...], onehot, preferred_element_type=jnp.float32)
    out_ref[...] = out.astype(out_ref.dtype)


def _embedding_lookup_t(idx_flat: jax.Array, table_t: jax.Array,
                        *, tn_max: int = 2048) -> jax.Array:
    """idx_flat: [N] int, table_t: [D, V] -> [D, N_pad] in the table dtype.

    Output stays in the kernel's lane-dense transposed layout; callers slice
    the valid columns/rows BEFORE any transpose so no padding is moved.
    One-hot-matmul gather; valid for small vocabularies (table fits VMEM).
    """
    n = idx_flat.shape[0]
    d, v = table_t.shape
    tn = _choose_tn(n, v, d, tn_max)
    n_pad = _round_up(n, tn)

    # Lane-major index layout: one (1, tn) block per grid step.  Padded tail
    # indices are 0 (gather a real row); their columns are sliced off later.
    idx2d = jnp.pad(idx_flat.astype(jnp.int32), (0, n_pad - n)).reshape(1, n_pad)

    out_t = pl.pallas_call(
        _embed_gather_kernel,
        out_shape=jax.ShapeDtypeStruct((d, n_pad), table_t.dtype),
        grid_spec=pltpu.PrefetchScalarGridSpec(
            num_scalar_prefetch=0,
            grid=(n_pad // tn,),
            in_specs=[
                pl.BlockSpec((1, tn), lambda i: (0, i)),         # indices, lane-dense
                pl.BlockSpec((d, v), lambda i: (0, 0)),          # whole transposed table
            ],
            out_specs=pl.BlockSpec((d, tn), lambda i: (0, i)),   # lane-dense output
        ),
        compiler_params=pltpu.CompilerParams(
            dimension_semantics=("parallel",),                   # v7x: shard tiles over 2 TCs
            vmem_limit_bytes=_VMEM_LIMIT_BYTES),
    )(idx2d, table_t)

    return out_t                                                 # [D, N_pad]


def init_feature_embedding_params(relation_table, type_table):
    """One-time parameter prep (hoisted out of the forward pass).

    Stacks both embedding tables (column-padded to a common width, relation
    rows placed after the type vocabulary) and transposes to [Dc, Vt+Vr] so
    the forward pass performs zero per-call HBM ops on the parameters.
    """
    rel_dim = int(relation_table.shape[1])
    type_dim = int(type_table.shape[1])
    vt = int(type_table.shape[0])
    dc = max(rel_dim, type_dim)
    dtype = jnp.promote_types(relation_table.dtype, type_table.dtype)

    type_pad = jnp.pad(type_table.astype(dtype), ((0, 0), (0, dc - type_dim)))
    rel_pad = jnp.pad(relation_table.astype(dtype), ((0, 0), (0, dc - rel_dim)))
    combined_t = jnp.concatenate([type_pad, rel_pad], axis=0).T   # [Dc, Vt+Vr]

    meta = dict(vt=vt, rel_dim=rel_dim, type_dim=type_dim)
    return combined_t, meta


@functools.partial(jax.jit,
                   static_argnames=("vt", "rel_dim", "type_dim", "tn_max"))
def feature_embedding_forward(x, combined_t, *, vt, rel_dim, type_dim,
                              tn_max: int = 2048):
    """Pallas equivalent of FeatureEmbedding.forward.

    x: [B, S, F] int32; combined_t/meta from init_feature_embedding_params.
    Returns (relation_embeds [B, S, rel_dim], types_embeds [B, S, F-2, type_dim]).
    """
    b, s, f = x.shape

    # Fused index stream: entity-type indices first, relation indices offset
    # past the type vocabulary.
    type_idx = x[:, :, :-2].reshape(-1).astype(jnp.int32)        # [B*S*(F-2)]
    rel_idx = x[:, :, -1].reshape(-1).astype(jnp.int32) + vt     # [B*S]
    idx_all = jnp.concatenate([type_idx, rel_idx], axis=0)
    nt = b * s * (f - 2)
    n = nt + b * s

    out_t = _embedding_lookup_t(idx_all, combined_t, tn_max=tn_max)  # [Dc, N_pad]

    # Slice valid rows/columns FIRST, then transpose only real data (no padding
    # is ever read back or transposed).
    type_out = out_t[:type_dim, :nt].T.reshape(b, s, f - 2, type_dim)
    rel_out = out_t[:rel_dim, nt:n].T.reshape(b, s, rel_dim)
    return rel_out, type_out


def init_params(key,
                relation_vocab_size, relation_embedding_dim,
                entity_type_vocab_size, entity_type_embedding_dim,
                pad_index):
    """Deterministic stand-in for nn.Embedding weights (N(0,1) init)."""
    k1, k2 = jax.random.split(key)
    rel_table = jax.random.normal(
        k1, (relation_vocab_size, relation_embedding_dim), jnp.float32)
    type_table = jax.random.normal(
        k2, (entity_type_vocab_size, entity_type_embedding_dim), jnp.float32)
    # padding_idx row is zeroed by nn.Embedding(padding_idx=...)
    type_table = type_table.at[pad_index].set(0.0)
    return rel_table, type_table


if __name__ == "__main__":
    # Small, forward-consistent shapes.
    B, S, F = 2, 8, 5                 # 3 entity-type columns, 1 unused, 1 relation column
    relation_vocab_size, relation_embedding_dim = 32, 16
    entity_type_vocab_size, entity_type_embedding_dim = 24, 16
    pad_index = 0                     # '#PAD_TOKEN' index

    key = jax.random.PRNGKey(0)
    kp, kt, kr, ku = jax.random.split(key, 4)

    rel_table, type_table = init_params(
        kp, relation_vocab_size, relation_embedding_dim,
        entity_type_vocab_size, entity_type_embedding_dim, pad_index)

    # One-time table prep (hoisted out of forward).
    combined_t, meta = init_feature_embedding_params(rel_table, type_table)
    jax.block_until_ready(combined_t)

    # Build x: type columns in [0, entity_type_vocab), unused column, relation
    # column in [0, relation_vocab).
    type_cols = jax.random.randint(kt, (B, S, F - 2), 0, entity_type_vocab_size, jnp.int32)
    unused_col = jax.random.randint(ku, (B, S, 1), 0, 4, jnp.int32)
    rel_col = jax.random.randint(kr, (B, S, 1), 0, relation_vocab_size, jnp.int32)
    x = jnp.concatenate([type_cols, unused_col, rel_col], axis=-1)   # [B, S, F]

    rel_embeds, type_embeds = feature_embedding_forward(
        x, combined_t,
        vt=meta["vt"], rel_dim=meta["rel_dim"], type_dim=meta["type_dim"],
        tn_max=2048)
    jax.block_until_ready((rel_embeds, type_embeds))

    # Reference check against plain-JAX gathers (tight tolerance would catch
    # any bf16 demotion of the f32 one-hot matmul).
    rel_ref = rel_table[x[:, :, -1]]
    type_ref = type_table[x[:, :, :-2]]
    assert rel_embeds.shape == (B, S, relation_embedding_dim)
    assert type_embeds.shape == (B, S, F - 2, entity_type_embedding_dim)
    assert jnp.allclose(rel_embeds, rel_ref, atol=1e-6)
    assert jnp.allclose(type_embeds, type_ref, atol=1e-6)

    print("KERNEL_OK")
</pallas_src>

<mosaic_0001>
module attributes {stable_mosaic.version = 11 : i64} {
  func.func @_embed_gather_kernel(%arg0: i32, %arg1: memref<1x128xi32, #tpu.memory_space<vmem>>, %arg2: memref<16x56xf32, #tpu.memory_space<vmem>>, %arg3: memref<16x128xf32, #tpu.memory_space<vmem>>) attributes {dimension_semantics = [#tpu.dimension_semantics<parallel>], iteration_bounds = array<i64: 1>, scalar_prefetch = 0 : i64, scratch_operands = 0 : i64, tpu.core_type = #tpu.core_type<tc>, window_params = [{transform_indices = @transform_0, window_bounds = array<i64: 1, 128>}, {pipeline_mode = #tpu.pipeline_mode<synchronous>, transform_indices = @transform_1, window_bounds = array<i64: 16, 56>}, {transform_indices = @transform_2, window_bounds = array<i64: 16, 128>}]} {
    %c0 = arith.constant 0 : index
    %c0_0 = arith.constant 0 : index
    %0 = vector.load %arg1[%c0, %c0_0] : memref<1x128xi32, #tpu.memory_space<vmem>>, vector<1x128xi32>
    %1 = tpu.iota {dimensions = array<i32: 0>} : vector<56x128xi32>
    %2 = vector.broadcast %0 : vector<1x128xi32> to vector<56x128xi32>
    %3 = arith.cmpi eq, %1, %2 : vector<56x128xi32>
    %4 = arith.extui %3 : vector<56x128xi1> to vector<56x128xi32>
    %5 = arith.sitofp %4 : vector<56x128xi32> to vector<56x128xf32>
    %c0_1 = arith.constant 0 : index
    %c0_2 = arith.constant 0 : index
    %6 = vector.load %arg2[%c0_1, %c0_2] : memref<16x56xf32, #tpu.memory_space<vmem>>, vector<16x56xf32>
    %cst = arith.constant dense<0.000000e+00> : vector<16x128xf32>
    %7 = tpu.matmul %6, %5, %cst {dimension_numbers = #tpu.dot_dimension_numbers<[1], [0], [0], [1], [0, 0, 1, 1], [], []>} : vector<16x56xf32>, vector<56x128xf32>, vector<16x128xf32> -> vector<16x128xf32>
    %c0_3 = arith.constant 0 : index
    %c0_4 = arith.constant 0 : index
    %8 = vector.load %arg3[%c0_3, %c0_4] : memref<16x128xf32, #tpu.memory_space<vmem>>, vector<16x128xf32>
    tpu.vector_store %arg3[%c0_3, %c0_4], %7 {strides = array<i32>} : memref<16x128xf32, #tpu.memory_space<vmem>>, vector<16x128xf32>,
    return
  }
  func.func @transform_0(%arg0: i32) -> (i32, i32) {
    %c0_i32 = arith.constant 0 : i32
    %c0_i32_0 = arith.constant 0 : i32
    return %c0_i32, %arg0 : i32, i32
  }
  func.func @transform_1(%arg0: i32) -> (i32, i32) {
    %c0_i32 = arith.constant 0 : i32
    %c0_i32_0 = arith.constant 0 : i32
    %c0_i32_1 = arith.constant 0 : i32
    return %c0_i32, %c0_i32_0 : i32, i32
  }
  func.func @transform_2(%arg0: i32) -> (i32, i32) {
    %c0_i32 = arith.constant 0 : i32
    %c0_i32_0 = arith.constant 0 : i32
    return %c0_i32, %arg0 : i32, i32
  }
}

</mosaic_0001>

<bundles_post_ra>
// kernel: feature_embedding_forward.1
= control target key start
LH: loop header
LB: loop body
LE: loop exit
PB: predicated region body
PF: predicated region fallthrough
CT: control target
= control target key end

     0   :  { %v12_v0 = vlaneseq  ;;  %vm47_vm0 = vcmask 457728   ;;  %v179_v8 = vmov 1.0   ;;  %s212_s0 = inlined_call_operand.vmem [shape: s32[1,128], index: 0, kind: input, shape index: {}]   ;;  %s213_s1 = inlined_call_operand.vmem [shape: f32[16,56], index: 1, kind: input, shape index: {}]   ;;  %s214_s2 = inlined_call_operand.vmem [shape: f32[16,128], index: 2, kind: output, shape index: {}]  }
   0x1   :  { %v45_v1 = vld [vmem:[%s213_s1] sm:$0xff]  ;;  %v46_v11 = vld [vmem:[%s213_s1 + $0x8] sm:$0xff] }
   0x2   :  { %v13_v2 = vshrl.u32 %v12_v0, 7  ;;  %175 = vmatprep.mubr.msk.f32.mxu0 %vm47_vm0, %v45_v1  ;;  %v135_v3 = vld [vmem:[%s212_s0] ss:$0 sm:$0xff] }
   0x4   :  { %v19_v4 = vadd.s32 48, %v13_v2  ;;  %v18_v5 = vadd.s32 40, %v13_v2  ;;  %v17_v6 = vadd.s32 32, %v13_v2  ;;  %v16_v7 = vadd.s32 24, %v13_v2 }
   0x5   :  { %v15_v9 = vadd.s32 16, %v13_v2  ;;  %v14_v10 = vadd.s32 8, %v13_v2  ;;  %vm24_vm7 = vcmp.eq.s32.totalorder %v13_v2, %v135_v3 }
   0x6   :  { %vm30_vm1 = vcmp.eq.s32.totalorder %v19_v4, %v135_v3  ;;  %vm29_vm2 = vcmp.eq.s32.totalorder %v18_v5, %v135_v3  ;;  %vm28_vm3 = vcmp.eq.s32.totalorder %v17_v6, %v135_v3  ;;  %vm27_vm4 = vcmp.eq.s32.totalorder %v16_v7, %v135_v3 }
   0x7   :  { %161 = vmatprep.subr.msk.mxu0 %vm30_vm1, %v179_v8  ;;  %vm26_vm5 = vcmp.eq.s32.totalorder %v15_v9, %v135_v3  ;;  %vm25_vm6 = vcmp.eq.s32.totalorder %v14_v10, %v135_v3 }
   0x8   :  { %162 = vmatpush3.msk.msra.mxu0 %vm30_vm1, %v179_v8 }
   0x9   :  { %163 = vmatprep.subr.msk.mxu0 %vm29_vm2, %v179_v8 }
   0xa   :  { %164 = vmatpush3.msk.msra.mxu0 %vm29_vm2, %v179_v8 }
   0xb   :  { %165 = vmatprep.subr.msk.mxu0 %vm28_vm3, %v179_v8 }
   0xc   :  { %166 = vmatpush3.msk.msra.mxu0 %vm28_vm3, %v179_v8 }
   0xd   :  { %167 = vmatprep.subr.msk.mxu0 %vm27_vm4, %v179_v8 }
   0xe   :  { %168 = vmatpush3.msk.msra.mxu0 %vm27_vm4, %v179_v8 }
   0xf   :  { %169 = vmatprep.subr.msk.mxu0 %vm26_vm5, %v179_v8 }
  0x10   :  { %170 = vmatpush3.msk.msra.mxu0 %vm26_vm5, %v179_v8 }
  0x11   :  { %171 = vmatprep.subr.msk.mxu0 %vm25_vm6, %v179_v8 }
  0x12   :  { %172 = vmatpush3.msk.msra.mxu0 %vm25_vm6, %v179_v8 }
  0x13   :  { %173 = vmatprep.subr.msk.mxu0 %vm24_vm7, %v179_v8 }
  0x14   :  { %174 = vmatpush3.msk.msra.mxu0 %vm24_vm7, %v179_v8 }
  0x15   :  { %176 = vmatmul.mubr.msk.f32.vlgmr.msra.gmra.mxu0 %vm47_vm0, %v46_v11 }
  0xd5   :  { %v177_v12 = vpop.f32.mrf.mxu0 }
  0xd6   :  { %130 = vst [vmem:[%s214_s2 + $0x8] sm:$0xff] %v177_v12 }
  0xd7   :  { %v120_v13 = vpop.f32.mrf.mxu0 }
  0xd8   :  { %129 = vst [vmem:[%s214_s2] sm:$0xff] %v120_v13 }

</bundles_post_ra>
